<compile_context>
chip_gen: v6e
topology: v6e:2x2x1
jax: 0.10.0
libtpu: 0.0.40
codegen_flags: <defaults>
</compile_context>

<pallas_src>
import functools

import jax
import jax.numpy as jnp
from jax.experimental import pallas as pl
from jax.experimental.pallas import tpu as pltpu

LANE = 128     # f32 lane width
SUBLANE = 8    # f32 sublane height


def _cdiv(a, b):
    return -(-a // b)


def _round_up(x, m):
    return _cdiv(x, m) * m


def _pick_vmem_limit():
    """~3/4 of per-core VMEM (respects v7x's 64 MiB), 32 MiB fallback."""
    default = 32 * 1024 * 1024
    try:
        cap = int(pltpu.get_tpu_info().vmem_capacity_bytes)
    except Exception:
        return default
    return max(default, min(cap * 3 // 4, 96 * 1024 * 1024))


def actor_forward_kernel(x_ref, w1_ref, b1_ref, w2_ref, b2_ref, w3_ref, b3_ref,
                         mask_ref, out_ref, *, out_dim):
    # fc1 + ReLU  (bf16 MXU operands, f32 accumulate & elementwise)
    x = x_ref[...].astype(jnp.bfloat16)
    h1 = jnp.dot(x, w1_ref[...], preferred_element_type=jnp.float32)
    h1 = jnp.maximum(h1 + b1_ref[...], 0.0)

    # fc2 + ReLU
    h2 = jnp.dot(h1.astype(jnp.bfloat16), w2_ref[...],
                 preferred_element_type=jnp.float32)
    h2 = jnp.maximum(h2 + b2_ref[...], 0.0)

    # actor_head + ReLU  (matches the reference: ReLU before softmax)
    logits = jnp.dot(h2.astype(jnp.bfloat16), w3_ref[...],
                     preferred_element_type=jnp.float32)
    logits = jnp.maximum(logits + b3_ref[...], 0.0)

    # Additive mask row: 0 on real output columns, -1e30 on padded lanes, so
    # exp() underflows to exactly 0 and padding never enters the denominator.
    logits = logits + mask_ref[...]

    # Numerically stable softmax over dim=1.  Exact divide (denom is (TM,1))
    # so every output row sums to 1 at f32 precision.
    m = jnp.max(logits, axis=1, keepdims=True)
    e = jnp.exp(logits - m)
    denom = jnp.sum(e, axis=1, keepdims=True)
    out_ref[...] = (e[:, :out_dim] / denom).astype(out_ref.dtype)


def actor_forward(state, prepared, *, tile_m_max=4096):
    """state: (B, input_dim) float32.  prepared: output of prepare_actor_params."""
    w1, b1 = prepared["w1"], prepared["b1"]
    w2, b2 = prepared["w2"], prepared["b2"]
    w3, b3 = prepared["w3"], prepared["b3"]
    mask = prepared["mask"]
    out_dim = prepared["out_dim"]

    B, in_dim = state.shape
    HP = w1.shape[1]   # padded hidden dim (multiple of 128)
    OP = w3.shape[1]   # padded output dim (multiple of 128)

    # Batch tile: as large as tile_m_max allows while keeping batch padding
    # below one sublane (<8 wasted rows), avoiding up-to-TM-1-row waste.
    n_tiles = _cdiv(B, tile_m_max)
    TM = _round_up(_cdiv(B, n_tiles), SUBLANE)
    B_pad = TM * n_tiles
    if B_pad != B:
        state = jnp.pad(state, ((0, B_pad - B), (0, 0)))

    kernel = functools.partial(actor_forward_kernel, out_dim=out_dim)

    out = pl.pallas_call(
        kernel,
        # Output carries only the real probability columns: no 128-wide
        # padded writeback and no post-kernel column slice.
        out_shape=jax.ShapeDtypeStruct((B_pad, out_dim), jnp.float32),
        grid=(n_tiles,),
        in_specs=[
            pl.BlockSpec((TM, in_dim), lambda i: (i, 0)),   # state tile (pipelined)
            pl.BlockSpec((in_dim, HP), lambda i: (0, 0)),   # w1 (VMEM-resident)
            pl.BlockSpec((1, HP), lambda i: (0, 0)),        # b1
            pl.BlockSpec((HP, HP), lambda i: (0, 0)),       # w2
            pl.BlockSpec((1, HP), lambda i: (0, 0)),        # b2
            pl.BlockSpec((HP, OP), lambda i: (0, 0)),       # w3
            pl.BlockSpec((1, OP), lambda i: (0, 0)),        # b3
            pl.BlockSpec((1, OP), lambda i: (0, 0)),        # additive column mask
        ],
        out_specs=pl.BlockSpec((TM, out_dim), lambda i: (i, 0)),
        compiler_params=pltpu.CompilerParams(
            dimension_semantics=("parallel",),   # megacore-shardable on v7x
            vmem_limit_bytes=_pick_vmem_limit(),
        ),
    )(state, w1, b1, w2, b2, w3, b3, mask)

    # Only a tiny (<8 row) slice remains for ragged batches.
    return out if B_pad == B else out[:B]


def xavier_uniform(key, fan_in, fan_out, dtype=jnp.float32):
    # Matches torch.nn.init.xavier_uniform_: U(-a, a), a = sqrt(6/(fan_in+fan_out))
    bound = (6.0 / (fan_in + fan_out)) ** 0.5
    return jax.random.uniform(key, (fan_in, fan_out), dtype=dtype,
                              minval=-bound, maxval=bound)


def init_actor_params(key, input_dim, hidden_dim, output_dim):
    """Logical (PyTorch-equivalent) parameters, stored as (in, out) so y = x@W+b."""
    k1, k2, k3 = jax.random.split(key, 3)
    return {
        "w1": xavier_uniform(k1, input_dim, hidden_dim),
        "b1": jnp.zeros((hidden_dim,), jnp.float32),
        "w2": xavier_uniform(k2, hidden_dim, hidden_dim),
        "b2": jnp.zeros((hidden_dim,), jnp.float32),
        "w3": xavier_uniform(k3, hidden_dim, output_dim),
        "b3": jnp.zeros((output_dim,), jnp.float32),
    }


def prepare_actor_params(params):
    """One-time prep: zero-pad hidden/output dims to multiples of 128 (lane-dense),
    cast weights to bf16 for the MXU (f32 accumulation in-kernel), and build the
    additive -1e30 mask row for padded output columns."""
    in_dim, hidden_dim = params["w1"].shape
    output_dim = params["w3"].shape[1]
    HP = _round_up(hidden_dim, LANE)
    OP = _round_up(output_dim, LANE)

    def pad2(w, rows, cols):
        return jnp.pad(w, ((0, rows - w.shape[0]), (0, cols - w.shape[1])))

    def pad_bias(b, cols):
        return jnp.pad(b, (0, cols - b.shape[0])).reshape(1, cols)

    col_mask = jnp.where(jnp.arange(OP) < output_dim, 0.0, -1e30)
    return {
        "w1": pad2(params["w1"], in_dim, HP).astype(jnp.bfloat16),
        "b1": pad_bias(params["b1"], HP),
        "w2": pad2(params["w2"], HP, HP).astype(jnp.bfloat16),
        "b2": pad_bias(params["b2"], HP),
        "w3": pad2(params["w3"], HP, OP).astype(jnp.bfloat16),
        "b3": pad_bias(params["b3"], OP),
        "mask": col_mask.reshape(1, OP).astype(jnp.float32),
        "out_dim": output_dim,
    }


if __name__ == "__main__":
    input_dim, hidden_dim, output_dim = 4, 32, 2   # CartPole-ish sizes
    batch = 2

    key = jax.random.PRNGKey(0)
    pkey, skey = jax.random.split(key)
    params = init_actor_params(pkey, input_dim, hidden_dim, output_dim)
    prepared = prepare_actor_params(params)
    state = jax.random.normal(skey, (batch, input_dim), jnp.float32)

    probs = actor_forward(state, prepared)
    jax.block_until_ready(probs)

    # Pure-JAX f32 reference (bf16 matmul operands in the kernel introduce a
    # small relative error vs. the f32 reference, hence the loose tolerance).
    def ref_forward(x, p):
        h = jnp.maximum(x @ p["w1"] + p["b1"], 0.0)
        h = jnp.maximum(h @ p["w2"] + p["b2"], 0.0)
        lg = jnp.maximum(h @ p["w3"] + p["b3"], 0.0)
        return jax.nn.softmax(lg, axis=1)

    ref = ref_forward(state, params)

    assert probs.shape == (batch, output_dim)
    # Exact divide in the kernel -> rows sum to 1 at f32 precision.
    assert bool(jnp.allclose(jnp.sum(probs, axis=1), 1.0, atol=1e-4))
    assert bool(jnp.allclose(probs, ref, atol=3e-2))

    # Multi-tile / ragged-batch path: 3 grid steps, <8 rows of batch padding.
    state2 = jax.random.normal(jax.random.PRNGKey(1), (37, input_dim), jnp.float32)
    probs2 = actor_forward(state2, prepared, tile_m_max=16)
    jax.block_until_ready(probs2)
    assert probs2.shape == (37, output_dim)
    assert bool(jnp.allclose(jnp.sum(probs2, axis=1), 1.0, atol=1e-4))
    assert bool(jnp.allclose(probs2, ref_forward(state2, params), atol=3e-2))

    print("KERNEL_OK")
</pallas_src>

<mosaic_0001>
module attributes {stable_mosaic.version = 11 : i64} {
  func.func @actor_forward_kernel(%arg0: i32, %arg1: memref<8x4xf32, #tpu.memory_space<vmem>>, %arg2: memref<4x128xbf16, #tpu.memory_space<vmem>>, %arg3: memref<1x128xf32, #tpu.memory_space<vmem>>, %arg4: memref<128x128xbf16, #tpu.memory_space<vmem>>, %arg5: memref<1x128xf32, #tpu.memory_space<vmem>>, %arg6: memref<128x128xbf16, #tpu.memory_space<vmem>>, %arg7: memref<1x128xf32, #tpu.memory_space<vmem>>, %arg8: memref<1x128xf32, #tpu.memory_space<vmem>>, %arg9: memref<8x2xf32, #tpu.memory_space<vmem>>) attributes {dimension_semantics = [#tpu.dimension_semantics<parallel>], iteration_bounds = array<i64: 1>, scalar_prefetch = 0 : i64, scratch_operands = 0 : i64, tpu.core_type = #tpu.core_type<tc>, window_params = [{transform_indices = @transform_0, window_bounds = array<i64: 8, 4>}, {pipeline_mode = #tpu.pipeline_mode<synchronous>, transform_indices = @transform_1, window_bounds = array<i64: 4, 128>}, {pipeline_mode = #tpu.pipeline_mode<synchronous>, transform_indices = @transform_2, window_bounds = array<i64: 1, 128>}, {pipeline_mode = #tpu.pipeline_mode<synchronous>, transform_indices = @transform_3, window_bounds = array<i64: 128, 128>}, {pipeline_mode = #tpu.pipeline_mode<synchronous>, transform_indices = @transform_4, window_bounds = array<i64: 1, 128>}, {pipeline_mode = #tpu.pipeline_mode<synchronous>, transform_indices = @transform_5, window_bounds = array<i64: 128, 128>}, {pipeline_mode = #tpu.pipeline_mode<synchronous>, transform_indices = @transform_6, window_bounds = array<i64: 1, 128>}, {pipeline_mode = #tpu.pipeline_mode<synchronous>, transform_indices = @transform_7, window_bounds = array<i64: 1, 128>}, {transform_indices = @transform_8, window_bounds = array<i64: 8, 2>}]} {
    %c0 = arith.constant 0 : index
    %c0_0 = arith.constant 0 : index
    %0 = vector.load %arg1[%c0, %c0_0] : memref<8x4xf32, #tpu.memory_space<vmem>>, vector<8x4xf32>
    %1 = arith.truncf %0 : vector<8x4xf32> to vector<8x4xbf16>
    %c0_1 = arith.constant 0 : index
    %c0_2 = arith.constant 0 : index
    %2 = vector.load %arg2[%c0_1, %c0_2] : memref<4x128xbf16, #tpu.memory_space<vmem>>, vector<4x128xbf16>
    %cst = arith.constant dense<0.000000e+00> : vector<8x128xf32>
    %3 = tpu.matmul %1, %2, %cst {dimension_numbers = #tpu.dot_dimension_numbers<[1], [0], [0], [1], [0, 0, 1, 1], [], []>} : vector<8x4xbf16>, vector<4x128xbf16>, vector<8x128xf32> -> vector<8x128xf32>
    %c0_3 = arith.constant 0 : index
    %c0_4 = arith.constant 0 : index
    %4 = vector.load %arg3[%c0_3, %c0_4] : memref<1x128xf32, #tpu.memory_space<vmem>>, vector<1x128xf32>
    %5 = vector.broadcast %4 : vector<1x128xf32> to vector<8x128xf32>
    %6 = arith.addf %3, %5 : vector<8x128xf32>
    %cst_5 = arith.constant 0.000000e+00 : f32
    %7 = vector.broadcast %cst_5 : f32 to vector<8x128xf32>
    %8 = arith.maximumf %6, %7 : vector<8x128xf32>
    %9 = arith.truncf %8 : vector<8x128xf32> to vector<8x128xbf16>
    %c0_6 = arith.constant 0 : index
    %c0_7 = arith.constant 0 : index
    %10 = vector.load %arg4[%c0_6, %c0_7] : memref<128x128xbf16, #tpu.memory_space<vmem>>, vector<128x128xbf16>
    %cst_8 = arith.constant dense<0.000000e+00> : vector<8x128xf32>
    %11 = tpu.matmul %9, %10, %cst_8 {dimension_numbers = #tpu.dot_dimension_numbers<[1], [0], [0], [1], [0, 0, 1, 1], [], []>} : vector<8x128xbf16>, vector<128x128xbf16>, vector<8x128xf32> -> vector<8x128xf32>
    %c0_9 = arith.constant 0 : index
    %c0_10 = arith.constant 0 : index
    %12 = vector.load %arg5[%c0_9, %c0_10] : memref<1x128xf32, #tpu.memory_space<vmem>>, vector<1x128xf32>
    %13 = vector.broadcast %12 : vector<1x128xf32> to vector<8x128xf32>
    %14 = arith.addf %11, %13 : vector<8x128xf32>
    %cst_11 = arith.constant 0.000000e+00 : f32
    %15 = vector.broadcast %cst_11 : f32 to vector<8x128xf32>
    %16 = arith.maximumf %14, %15 : vector<8x128xf32>
    %17 = arith.truncf %16 : vector<8x128xf32> to vector<8x128xbf16>
    %c0_12 = arith.constant 0 : index
    %c0_13 = arith.constant 0 : index
    %18 = vector.load %arg6[%c0_12, %c0_13] : memref<128x128xbf16, #tpu.memory_space<vmem>>, vector<128x128xbf16>
    %cst_14 = arith.constant dense<0.000000e+00> : vector<8x128xf32>
    %19 = tpu.matmul %17, %18, %cst_14 {dimension_numbers = #tpu.dot_dimension_numbers<[1], [0], [0], [1], [0, 0, 1, 1], [], []>} : vector<8x128xbf16>, vector<128x128xbf16>, vector<8x128xf32> -> vector<8x128xf32>
    %c0_15 = arith.constant 0 : index
    %c0_16 = arith.constant 0 : index
    %20 = vector.load %arg7[%c0_15, %c0_16] : memref<1x128xf32, #tpu.memory_space<vmem>>, vector<1x128xf32>
    %21 = vector.broadcast %20 : vector<1x128xf32> to vector<8x128xf32>
    %22 = arith.addf %19, %21 : vector<8x128xf32>
    %cst_17 = arith.constant 0.000000e+00 : f32
    %23 = vector.broadcast %cst_17 : f32 to vector<8x128xf32>
    %24 = arith.maximumf %22, %23 : vector<8x128xf32>
    %c0_18 = arith.constant 0 : index
    %c0_19 = arith.constant 0 : index
    %25 = vector.load %arg8[%c0_18, %c0_19] : memref<1x128xf32, #tpu.memory_space<vmem>>, vector<1x128xf32>
    %26 = vector.broadcast %25 : vector<1x128xf32> to vector<8x128xf32>
    %27 = arith.addf %24, %26 : vector<8x128xf32>
    %cst_20 = arith.constant dense<0xFF800000> : vector<8xf32>
    %28 = vector.multi_reduction <maximumf>, %27, %cst_20 [1] : vector<8x128xf32> to vector<8xf32>
    %29 = vector.shape_cast %28 : vector<8xf32> to vector<8x1xf32>
    %30 = vector.broadcast %29 : vector<8x1xf32> to vector<8x128xf32>
    %31 = arith.subf %27, %30 : vector<8x128xf32>
    %32 = math.exp %31 : vector<8x128xf32>
    %cst_21 = arith.constant dense<0.000000e+00> : vector<8xf32>
    %33 = vector.multi_reduction <add>, %32, %cst_21 [1] : vector<8x128xf32> to vector<8xf32>
    %34 = vector.shape_cast %33 : vector<8xf32> to vector<8x1xf32>
    %35 = vector.extract_strided_slice %32 {offsets = [0, 0], sizes = [8, 2], strides = [1, 1]} : vector<8x128xf32> to vector<8x2xf32>
    %36 = vector.broadcast %34 : vector<8x1xf32> to vector<8x2xf32>
    %37 = arith.divf %35, %36 : vector<8x2xf32>
    %c0_22 = arith.constant 0 : index
    %c0_23 = arith.constant 0 : index
    %38 = vector.load %arg9[%c0_22, %c0_23] : memref<8x2xf32, #tpu.memory_space<vmem>>, vector<8x2xf32>
    tpu.vector_store %arg9[%c0_22, %c0_23], %37 {strides = array<i32>} : memref<8x2xf32, #tpu.memory_space<vmem>>, vector<8x2xf32>,
    return
  }
  func.func @transform_0(%arg0: i32) -> (i32, i32) {
    %c0_i32 = arith.constant 0 : i32
    %c0_i32_0 = arith.constant 0 : i32
    return %arg0, %c0_i32 : i32, i32
  }
  func.func @transform_1(%arg0: i32) -> (i32, i32) {
    %c0_i32 = arith.constant 0 : i32
    %c0_i32_0 = arith.constant 0 : i32
    %c0_i32_1 = arith.constant 0 : i32
    return %c0_i32, %c0_i32_0 : i32, i32
  }
  func.func @transform_2(%arg0: i32) -> (i32, i32) {
    %c0_i32 = arith.constant 0 : i32
    %c0_i32_0 = arith.constant 0 : i32
    %c0_i32_1 = arith.constant 0 : i32
    return %c0_i32, %c0_i32_0 : i32, i32
  }
  func.func @transform_3(%arg0: i32) -> (i32, i32) {
    %c0_i32 = arith.constant 0 : i32
    %c0_i32_0 = arith.constant 0 : i32
    %c0_i32_1 = arith.constant 0 : i32
    return %c0_i32, %c0_i32_0 : i32, i32
  }
  func.func @transform_4(%arg0: i32) -> (i32, i32) {
    %c0_i32 = arith.constant 0 : i32
    %c0_i32_0 = arith.constant 0 : i32
    %c0_i32_1 = arith.constant 0 : i32
    return %c0_i32, %c0_i32_0 : i32, i32
  }
  func.func @transform_5(%arg0: i32) -> (i32, i32) {
    %c0_i32 = arith.constant 0 : i32
    %c0_i32_0 = arith.constant 0 : i32
    %c0_i32_1 = arith.constant 0 : i32
    return %c0_i32, %c0_i32_0 : i32, i32
  }
  func.func @transform_6(%arg0: i32) -> (i32, i32) {
    %c0_i32 = arith.constant 0 : i32
    %c0_i32_0 = arith.constant 0 : i32
    %c0_i32_1 = arith.constant 0 : i32
    return %c0_i32, %c0_i32_0 : i32, i32
  }
  func.func @transform_7(%arg0: i32) -> (i32, i32) {
    %c0_i32 = arith.constant 0 : i32
    %c0_i32_0 = arith.constant 0 : i32
    %c0_i32_1 = arith.constant 0 : i32
    return %c0_i32, %c0_i32_0 : i32, i32
  }
  func.func @transform_8(%arg0: i32) -> (i32, i32) {
    %c0_i32 = arith.constant 0 : i32
    %c0_i32_0 = arith.constant 0 : i32
    return %arg0, %c0_i32 : i32, i32
  }
}

</mosaic_0001>

<bundles_post_ra>
// kernel: tpu_custom_call.1
= control target key start
LH: loop header
LB: loop body
LE: loop exit
PB: predicated region body
PF: predicated region fallthrough
CT: control target
= control target key end

     0   :  { %13 = vsyncpa [#allocation3], 0  ;;  %s626_s0 = inlined_call_operand.vmem [shape: f32[8,4], index: 0, kind: input, shape index: {}]   ;;  %s627_s1 = inlined_call_operand.vmem [shape: bf16[4,128], index: 1, kind: input, shape index: {}]   ;;  %s628_s2 = inlined_call_operand.vmem [shape: f32[1,128], index: 2, kind: input, shape index: {}]   ;;  %s629_s3 = inlined_call_operand.hbm [shape: bf16[128,128], index: 3, kind: input, shape index: {}]   ;;  %s630_s4 = inlined_call_operand.vmem [shape: f32[1,128], index: 4, kind: input, shape index: {}]   ;;  %s631_s5 = inlined_call_operand.hbm [shape: bf16[128,128], index: 5, kind: input, shape index: {}]   ;;  %s632_s6 = inlined_call_operand.vmem [shape: f32[1,128], index: 6, kind: input, shape index: {}]   ;;  %s633_s7 = inlined_call_operand.vmem [shape: f32[1,128], index: 7, kind: input, shape index: {}]   ;;  %s634_s8 = inlined_call_operand.vmem [shape: f32[8,2], index: 8, kind: output, shape index: {}]  }
   0x1   :  { %14 = vsyncpa [#allocation5], 0  ;;  %s525_s27 = smov [#allocation2]  }
   0x2   :  { %s26_s28 = sshll.u32 %s525_s27, 4  ;;  %s27_s28 = int_to_ptr.vmem [resolvable:$true] %s26_s28 }
   0x3   :  { %s489_s29 = scalar_lea.vmem %s27_s28, 1024  ;;  %p494_p1 = scmp.lt.s32.totalorder %s27_s28, %s27_s28 }
   0x4   :  { %p490_p0 = scmp.ne.s32.totalorder %s27_s28, %s489_s29  ;;  %p495_p2 = scmp.lt.s32.totalorder %s489_s29, %s489_s29 }
   0x6   :  { %p496_p3 = por %p495_p2, %p494_p1 }
   0x8   :  { %p497_p4 = pnand %p496_p3, %p490_p0 }
   0xa   :  { %500 = shalt.err (!%p497_p4)
}
   0xb   :  { %s526_s30 = smov 64   ;;  %s527_s9 = smov 4  }
   0xc   :  { %32 = dma.hbm_to_vmem [thread:$0]  %s629_s3, 1024, %s27_s28, [#allocation3], %s526_s30, %s526_s30, %s527_s9  }
   0xd   :  { %s528_s12 = smov [#allocation4]  }
   0xe   :  { %s40_s13 = sshll.u32 %s528_s12, 4  ;;  %s41_s13 = int_to_ptr.vmem [resolvable:$true] %s40_s13 }
   0xf   :  { %s509_s14 = scalar_lea.vmem %s41_s13, 1024  ;;  %p514_p6 = scmp.lt.s32.totalorder %s41_s13, %s41_s13 }
  0x10   :  { %p510_p5 = scmp.ne.s32.totalorder %s41_s13, %s509_s14  ;;  %p515_p7 = scmp.lt.s32.totalorder %s509_s14, %s509_s14 }
  0x12   :  { %p516_p8 = por %p515_p7, %p514_p6 }
  0x14   :  { %p517_p9 = pnand %p516_p8, %p510_p5 }
  0x16   :  { %520 = shalt.err (!%p517_p9)
}
  0x17   :  { %46 = dma.hbm_to_vmem [thread:$0]  %s631_s5, 1024, %s41_s13, [#allocation5], %s526_s30, %s526_s30, %s527_s9  }
  0x18   :  { %521 = dma.done.wait [#allocation3], 1024  }
  0x19   :  { %522 = vsyncadd [#allocation3], 4294966272 }
  0x1a   :  { %523 = dma.done.wait [#allocation5], 1024  }
  0x1b   :  { %524 = vsyncadd [#allocation5], 4294966272  ;;  %v529_v0 = vmov 0.0   ;;  %vm530_vm0 = vmmov 0   ;;  %vm72_vm1 = vcmask 1041408   ;;  %v58_v2 = vld [vmem:[%s626_s0] sm:$0xff] }
  0x1c   :  { %409 = vmatprep.subr.bf16.mxu0 %v529_v0  ;;  %411 = vmatprep.mubr.msk.bf16.mxu0 %vm530_vm0, %v529_v0  ;;  %v60_v1 = vld [vmem:[%s627_s1] sm:$0x3]  ;;  %v59_v4 = vpack.c.bf16 %v58_v2, %v58_v2  ;;  %v461_v5 = vld [vmem:[#allocation2 + $0x38] sm:$0xff]   ;;  %vm68_vm2 = vcmask 31744   ;;  %v462_v6 = vld [vmem:[#allocation2 + $0x30] sm:$0xff]   ;;  %vm360_vm3 = vcmask 15360  }
  0x1d   :  { %415 = vmatprep.subr.bf16.mxu1 %v529_v0  ;;  %431 = vmatprep.mubr.msk.bf16.mxu1 %vm530_vm0, %v529_v0  ;;  %v74_v3 = vsel %vm72_vm1, %v60_v1, 0  ;;  %v463_v7 = vld [vmem:[#allocation2 + $0x28] sm:$0xff]   ;;  %v464_v8 = vld [vmem:[#allocation2 + $0x20] sm:$0xff]   ;;  %v465_v9 = vld [vmem:[#allocation2 + $0x18] sm:$0xff]  }
  0x1e   :  { %410 = vmatpush3.bf16.msra.mxu0 %v74_v3  ;;  %416 = vmatpush3.bf16.msra.mxu1 %v461_v5  ;;  %v466_v10 = vld [vmem:[#allocation2 + $0x10] sm:$0xff]   ;;  %v467_v11 = vld [vmem:[#allocation2 + $0x8] sm:$0xff]   ;;  %v468_v12 = vld [vmem:[#allocation2] sm:$0xff]  }
  0x1f   :  { %435 = vmatprep.subr.bf16.mxu0 %v529_v0  ;;  %417 = vmatprep.subr.bf16.mxu1 %v529_v0  ;;  %v469_v13 = vld [vmem:[#allocation4 + $0x38] sm:$0xff]   ;;  %v470_v14 = vld [vmem:[#allocation4 + $0x30] sm:$0xff]   ;;  %v471_v15 = vld [vmem:[#allocation4 + $0x28] sm:$0xff]  }
  0x20   :  { %v472_v16 = vld [vmem:[#allocation4 + $0x20] sm:$0xff]   ;;  %v473_v17 = vld [vmem:[#allocation4 + $0x18] sm:$0xff]   ;;  %v474_v18 = vld [vmem:[#allocation4 + $0x10] sm:$0xff]  }
  0x21   :  { %412 = vmatmul.mubr.msk.bf16.vlgmr.msra.gmra.mxu0 %vm68_vm2, %v59_v4  ;;  %v368_v19 = vld [vmem:[%s628_s2] ss:$0 sm:$0xff]  ;;  %v475_v27 = vld [vmem:[#allocation4 + $0x8] sm:$0xff]  }
  0x22   :  { %451 = vmatprep.mubr.msk.bf16.mxu0 %vm530_vm0, %v529_v0  ;;  %418 = vmatpush3.bf16.msra.mxu1 %v462_v6  ;;  %v476_v28 = vld [vmem:[#allocation4] sm:$0xff]  }
  0x23   :  { %419 = vmatprep.subr.bf16.mxu1 %v529_v0  ;;  %436 = vmatpush3.bf16.msra.mxu0 %v469_v13  ;;  %v370_v29 = vld [vmem:[%s630_s4] ss:$0 sm:$0xff] }
  0x24   :  { %437 = vmatprep.subr.bf16.mxu0 %v529_v0  ;;  %v379_v37 = vld [vmem:[%s632_s6] ss:$0 sm:$0xff] }
  0x25   :  { %v388_v41 = vld [vmem:[%s633_s7] ss:$0 sm:$0xff] }
  0x26   :  { %420 = vmatpush3.bf16.msra.mxu1 %v463_v7 }
  0x27   :  { %421 = vmatprep.subr.bf16.mxu1 %v529_v0  ;;  %438 = vmatpush3.bf16.msra.mxu0 %v470_v14 }
  0x28   :  { %439 = vmatprep.subr.bf16.mxu0 %v529_v0 }
  0x2a   :  { %422 = vmatpush3.bf16.msra.mxu1 %v464_v8 }
  0x2b   :  { %423 = vmatprep.subr.bf16.mxu1 %v529_v0  ;;  %440 = vmatpush3.bf16.msra.mxu0 %v471_v15 }
  0x2c   :  { %441 = vmatprep.subr.bf16.mxu0 %v529_v0 }
  0x2e   :  { %424 = vmatpush3.bf16.msra.mxu1 %v465_v9 }
  0x2f   :  { %425 = vmatprep.subr.bf16.mxu1 %v529_v0  ;;  %442 = vmatpush3.bf16.msra.mxu0 %v472_v16 }
  0x30   :  { %443 = vmatprep.subr.bf16.mxu0 %v529_v0 }
  0x32   :  { %426 = vmatpush3.bf16.msra.mxu1 %v466_v10 }
  0x33   :  { %427 = vmatprep.subr.bf16.mxu1 %v529_v0  ;;  %444 = vmatpush3.bf16.msra.mxu0 %v473_v17 }
  0x34   :  { %445 = vmatprep.subr.bf16.mxu0 %v529_v0 }
  0x36   :  { %428 = vmatpush3.bf16.msra.mxu1 %v467_v11 }
  0x37   :  { %429 = vmatprep.subr.bf16.mxu1 %v529_v0  ;;  %446 = vmatpush3.bf16.msra.mxu0 %v474_v18 }
  0x38   :  { %447 = vmatprep.subr.bf16.mxu0 %v529_v0 }
  0x3a   :  { %430 = vmatpush3.bf16.msra.mxu1 %v468_v12 }
  0x3b   :  { %448 = vmatpush3.bf16.msra.mxu0 %v475_v27 }
  0x3c   :  { %449 = vmatprep.subr.bf16.mxu0 %v529_v0 }
  0x3f   :  { %450 = vmatpush3.bf16.msra.mxu0 %v476_v28 }
  0xe1   :  { %v110_v20 = vpop.f32.mrf.mxu0 }
  0xe2   :  { %v111_v21 = vadd.f32 %v368_v19, %v110_v20 }
  0xe3   :  { %v413_v22 = vpop.f32.mrf.mxu0 }
  0xe4   :  { %v116_v23 = vmax.f32 %v111_v21, 0.0 }
  0xe5   :  { %v113_v24 = vpop.f32.mrf.mxu0 }
  0xe6   :  { %v117_v25 = vpack.c.bf16 %v116_v23, %v116_v23 }
  0xe7   :  { %v414_v26 = vpop.f32.mrf.mxu0 }
  0xe8   :  { %432 = vmatmul.mubr.bf16.vlgmr.msra.gmra.mxu1 %v117_v25 }
 0x1a8   :  { %v223_v30 = vpop.f32.mrf.mxu1 }
 0x1a9   :  { %v224_v31 = vadd.f32 %v370_v29, %v223_v30 }
 0x1aa   :  { %v433_v32 = vpop.f32.mrf.mxu1 }
 0x1ab   :  { %v229_v33 = vmax.f32 %v224_v31, 0.0 }
 0x1ac   :  { %v226_v34 = vpop.f32.mrf.mxu1 }
 0x1ad   :  { %v230_v35 = vpack.c.bf16 %v229_v33, %v229_v33 }
 0x1ae   :  { %v434_v36 = vpop.f32.mrf.mxu1 }
 0x1af   :  { %452 = vmatmul.mubr.bf16.vlgmr.msra.gmra.mxu0 %v230_v35 }
 0x26f   :  { %v336_v38 = vpop.f32.mrf.mxu0 }
 0x270   :  { %v337_v39 = vadd.f32 %v379_v37, %v336_v38 }
 0x271   :  { %v453_v40 = vpop.f32.mrf.mxu0 }
 0x272   :  { %v342_v42 = vmax.f32 %v337_v39, 0.0 }
 0x273   :  { %v339_v43 = vpop.f32.mrf.mxu0 }
 0x274   :  { %v350_v44 = vadd.f32 %v388_v41, %v342_v42 }
 0x275   :  { %v454_v45 = vpop.f32.mrf.mxu0 }
 0x276   :  { %351 = vmax.xlane.f32.xlu0 %v350_v44 }
 0x2ff   :  { %v352_v46 = vpop.xlane.xlu0 %351 }
 0x300   :  { %v353_v47 = vsub.f32 %v350_v44, %v352_v46 }
 0x302   :  { %v354_v48 = vmul.f32 1.442695, %v353_v47 }
 0x304   :  { %477 = vpow2.f32 %v354_v48 }
 0x311   :  { %v478_v49 = vpop.eup %477 }
 0x312   :  { %356 = vadd.xlane.f32.xlu0 %v478_v49 }
 0x39b   :  { %v357_v50 = vpop.xlane.xlu0 %356 }
 0x39c   :  { %479 = vrcp.f32 %v357_v50 }
 0x3a9   :  { %v480_v51 = vpop.eup %479 }
 0x3aa   :  { %v359_v52 = vmul.f32 %v480_v51, %v478_v49 }
 0x3ac   :  { %361 = vst.msk [vmem:[%s634_s8] sm:$0xff] %vm360_vm3, %v359_v52 }
 0x3ad   :  { %366 = vsyncpa [#allocation3], 1 }
 0x3ae   :  { %367 = vsyncpa [#allocation5], 1 }

</bundles_post_ra>
